<compile_context>
chip_gen: v5e
topology: v5e:2x2
jax: 0.10.0
libtpu: 0.0.40
codegen_flags: <defaults>
</compile_context>

<pallas_src>
import functools

import jax
import jax.numpy as jnp
from jax.experimental import pallas as pl
from jax.experimental.pallas import tpu as pltpu


def _gdrop_mul_kernel(x_ref, rnd_ref, o_ref):
    # x_ref:   (TR, THW)  tile of flattened activations
    # rnd_ref: (TR, 1)    per-row (per (n,c)) multiplicative noise, resident
    #                     across the inner (HW) grid axis.
    o_ref[...] = x_ref[...] * rnd_ref[...]


def _round_up(x, m):
    return ((x + m - 1) // m) * m


def _tile_budget_bytes():
    """Per-x-tile byte budget, chosen per chip generation (trace-time query)."""
    try:
        kind = jax.devices()[0].device_kind.lower()
    except Exception:  # pragma: no cover - defensive
        kind = ""
    if "v7" in kind:
        return 6 * 1024 * 1024   # fewer, bigger steps matter at ~3.2 TB/s HBM
    if "v6" in kind:
        return 4 * 1024 * 1024
    return 2 * 1024 * 1024        # v5e & anything unknown: stay conservative


@functools.partial(jax.jit, static_argnames=("strength", "deterministic"))
def gdrop_layer(x, key, strength=0.2, deterministic=False):
    """Generalized dropout, mode='mul', axes=(0, 1), on NCHW input."""
    if deterministic or not strength:
        return x

    N, C, H, W = x.shape
    NC, HW = N * C, H * W

    # Noise (tiny [N*C, 1] tensor, negligible wrapper work on the EUP):
    normal = jax.random.normal(key, (NC, 1), dtype=jnp.float32)
    rnd = jnp.power(jnp.float32(1.0 + strength), normal).astype(x.dtype)

    dtype_bytes = jnp.dtype(x.dtype).itemsize
    sublane = max(8, 8 * (4 // max(1, dtype_bytes)))   # 8 f32 / 16 bf16 / 32 int8
    LANE = 128

    # Small-tensor fallback: XLA's fused broadcast multiply beats a Pallas tile
    # whose lane/sublane padding would dominate the traffic.
    if HW < LANE or NC < sublane:
        return x * rnd.reshape(N, C, 1, 1)

    x2d = x.reshape(NC, HW)

    # ---- Tile selection (static, shape-driven; no array padding) ------------
    tile_budget = _tile_budget_bytes()

    # Lane-axis tile: multiple of 128, never larger than HW, capped by budget.
    max_hw = max(LANE, (tile_budget // (sublane * dtype_bytes)) // LANE * LANE)
    tile_hw = min(max_hw, (HW // LANE) * LANE)

    # Sublane-axis tile: multiple of packing, never larger than NC, budget-capped.
    max_rows = max(sublane,
                   (tile_budget // (tile_hw * dtype_bytes)) // sublane * sublane)
    tile_rows = min(max_rows, (NC // sublane) * sublane)

    # Megacore: guarantee >= 2 blocks on a parallel axis when possible so both
    # TensorCores of a v7x chip get work (harmless elsewhere).
    if pl.cdiv(NC, tile_rows) * pl.cdiv(HW, tile_hw) < 2:
        if NC >= 2 * sublane:
            tile_rows = _round_up(pl.cdiv(NC, 2), sublane)
        elif HW >= 2 * LANE:
            tile_hw = _round_up(pl.cdiv(HW, 2), LANE)

    grid = (pl.cdiv(NC, tile_rows), pl.cdiv(HW, tile_hw))

    # Explicit scoped-VMEM request for the chosen, double-buffered tiles
    # (x + out double-buffered, plus the lane-padded rnd block, plus slack).
    x_tile_bytes = tile_rows * tile_hw * dtype_bytes
    rnd_tile_bytes = tile_rows * LANE * max(dtype_bytes, 4)
    vmem_limit = 2 * (2 * x_tile_bytes) + 2 * rnd_tile_bytes + (2 << 20)
    vmem_limit = int(min(max(vmem_limit, 8 << 20), 48 << 20))

    out2d = pl.pallas_call(
        _gdrop_mul_kernel,
        out_shape=jax.ShapeDtypeStruct((NC, HW), x.dtype),
        grid_spec=pltpu.PrefetchScalarGridSpec(
            num_scalar_prefetch=0,
            grid=grid,
            in_specs=[
                pl.BlockSpec((tile_rows, tile_hw), lambda i, j: (i, j)),
                # rnd block index is invariant along the inner (HW) grid axis,
                # so it stays resident in VMEM across that loop.
                pl.BlockSpec((tile_rows, 1), lambda i, j: (i, 0)),
            ],
            out_specs=pl.BlockSpec((tile_rows, tile_hw), lambda i, j: (i, j)),
        ),
        compiler_params=pltpu.CompilerParams(
            dimension_semantics=("parallel", "parallel"),
            vmem_limit_bytes=vmem_limit,
        ),
    )(x2d, rnd)

    return out2d.reshape(N, C, H, W)


def _reference(x, key, strength):
    N, C, H, W = x.shape
    normal = jax.random.normal(key, (N * C, 1), dtype=jnp.float32)
    rnd = jnp.power(jnp.float32(1.0 + strength), normal).astype(x.dtype)
    return x * rnd.reshape(N, C, 1, 1)


if __name__ == "__main__":
    key = jax.random.PRNGKey(0)
    kx, kn, kx2, kn2, kx3, kn3 = jax.random.split(key, 6)

    # Primary check: typical NCHW usage, Pallas path (NC=8, HW=256).
    N, C, H, W = 2, 4, 16, 16
    x = jax.random.normal(kx, (N, C, H, W), dtype=jnp.float32)
    out = jax.block_until_ready(gdrop_layer(x, kn, strength=0.2,
                                            deterministic=False))
    ref = _reference(x, kn, 0.2)
    assert out.shape == x.shape and out.dtype == x.dtype
    assert jnp.allclose(out, ref, atol=1e-6, rtol=1e-6)

    # Deterministic path returns x unchanged.
    out_det = jax.block_until_ready(
        gdrop_layer(x, kn, strength=0.2, deterministic=True))
    assert jnp.array_equal(out_det, x)

    # Unaligned Pallas path: NC=9 (not a multiple of 8), HW=144 (not a multiple
    # of 128) -> exercises partial boundary blocks with the cdiv grid (no pad).
    x2 = jax.random.normal(kx2, (3, 3, 12, 12), dtype=jnp.float32)
    out2 = jax.block_until_ready(gdrop_layer(x2, kn2, strength=0.2,
                                             deterministic=False))
    ref2 = _reference(x2, kn2, 0.2)
    assert out2.shape == x2.shape
    assert jnp.allclose(out2, ref2, atol=1e-6, rtol=1e-6)

    # Tiny spatial map (HW=49 < 128) -> XLA fallback path.
    x3 = jax.random.normal(kx3, (2, 3, 7, 7), dtype=jnp.float32)
    out3 = jax.block_until_ready(gdrop_layer(x3, kn3, strength=0.2,
                                             deterministic=False))
    ref3 = _reference(x3, kn3, 0.2)
    assert jnp.allclose(out3, ref3, atol=1e-6, rtol=1e-6)

    print("KERNEL_OK")
</pallas_src>

<mosaic_0001>
module attributes {stable_mosaic.version = 11 : i64} {
  func.func @_gdrop_mul_kernel(%arg0: i32, %arg1: i32, %arg2: memref<8x128xf32, #tpu.memory_space<vmem>>, %arg3: memref<8x1xf32, #tpu.memory_space<vmem>>, %arg4: memref<8x128xf32, #tpu.memory_space<vmem>>) attributes {dimension_semantics = [#tpu.dimension_semantics<parallel>, #tpu.dimension_semantics<parallel>], iteration_bounds = array<i64: 1, 2>, scalar_prefetch = 0 : i64, scratch_operands = 0 : i64, tpu.core_type = #tpu.core_type<tc>, window_params = [{transform_indices = @transform_0, window_bounds = array<i64: 8, 128>}, {transform_indices = @transform_1, window_bounds = array<i64: 8, 1>}, {transform_indices = @transform_2, window_bounds = array<i64: 8, 128>}]} {
    %c0 = arith.constant 0 : index
    %c0_0 = arith.constant 0 : index
    %0 = vector.load %arg2[%c0, %c0_0] : memref<8x128xf32, #tpu.memory_space<vmem>>, vector<8x128xf32>
    %c0_1 = arith.constant 0 : index
    %c0_2 = arith.constant 0 : index
    %1 = vector.load %arg3[%c0_1, %c0_2] : memref<8x1xf32, #tpu.memory_space<vmem>>, vector<8x1xf32>
    %2 = vector.broadcast %1 : vector<8x1xf32> to vector<8x128xf32>
    %3 = arith.mulf %0, %2 : vector<8x128xf32>
    %c0_3 = arith.constant 0 : index
    %c0_4 = arith.constant 0 : index
    %4 = vector.load %arg4[%c0_3, %c0_4] : memref<8x128xf32, #tpu.memory_space<vmem>>, vector<8x128xf32>
    tpu.vector_store %arg4[%c0_3, %c0_4], %3 {strides = array<i32>} : memref<8x128xf32, #tpu.memory_space<vmem>>, vector<8x128xf32>,
    return
  }
  func.func @transform_0(%arg0: i32, %arg1: i32) -> (i32, i32) {
    %c0_i32 = arith.constant 0 : i32
    return %arg0, %arg1 : i32, i32
  }
  func.func @transform_1(%arg0: i32, %arg1: i32) -> (i32, i32) {
    %c0_i32 = arith.constant 0 : i32
    %c0_i32_0 = arith.constant 0 : i32
    return %arg0, %c0_i32 : i32, i32
  }
  func.func @transform_2(%arg0: i32, %arg1: i32) -> (i32, i32) {
    %c0_i32 = arith.constant 0 : i32
    return %arg0, %arg1 : i32, i32
  }
}

</mosaic_0001>

<bundles_post_ra>
// kernel: gdrop_layer.1
= control target key start
LH: loop header
LB: loop body
LE: loop exit
PB: predicated region body
PF: predicated region fallthrough
CT: control target
= control target key end

     0   :  { %s376_s9 = smov 0   ;;  %s378_s10 = smov 0   ;;  %s400_s0 = inlined_call_operand.vmem [shape: f32[8,256], index: 0, kind: input, shape index: {}]   ;;  %s401_s1 = inlined_call_operand.vmem [shape: f32[8,1], index: 1, kind: input, shape index: {}]   ;;  %s402_s2 = inlined_call_operand.vmem [shape: f32[8,256], index: 2, kind: output, shape index: {}]  }
   0x1   :  { %s380_s11 = smov 0  }
   0x2 LB: > { %s21_s12 = sadd.s32 1, %s354_s10  ;;  %p305_p0 = scmp.ge.s32.totalorder %s358_s11, 1  ;;  %s358_s11 = sphi %s380_s11, %s12_s11   ;;  %s354_s10 = sphi %s378_s10, %s404_s10   ;;  %s350_s9 = sphi %s376_s9, %s403_s9  }
   0x3   : > { %p22_p1 = scmp.ge.s32.totalorder %s21_s12, 2  ;;  %p140_p2 = scmp.lt.s32.totalorder %s358_s11, 3 }
   0x5   : > { %s406_s12 = smov (%p22_p1, %s21_s12), 0  ;;  %p141_p3 = pnand %p305_p0, %p140_p2 }
   0x6   : > { %p174_p4 = scmp.lt.s32.totalorder (!%p141_p3), %s350_s9, 1 }
   0x7   : > { %144 = sbr.rel (%p141_p3) target bundleno = 132 (0x84), region = 28 }
   0xc   : > { %v193_v0 = vld [vmem:[%s401_s1] sm:$0xff]  ;;  %v360_v1 = vmov 0   ;;  %s408_s9 = smov (!%p174_p4, %s350_s9), 1 }
   0xd   : > { %335 = vset.pattern.permute.xlu0 %v360_v1  ;;  %s306_s15 = sshll.u32 %s408_s9, 3 }
   0xe   : > { %196 = vperm.xlu0 %335, %v193_v0   ;;  %s179_s18 = scalar_lea.vmem %s400_s0, %s306_s15  ;;  %s191_s21 = scalar_lea.vmem %s402_s2, %s306_s15 }
   0xf   : > { %v192_v2 = vld [vmem:[%s179_s18] sm:$0xff] }
  0x80   : > { %v197_v3 = vpop.permute.xlu0 %196 }
  0x81   : > { %v199_v4 = vmul.f32 %v197_v3, %v192_v2 }
  0x83   : > { %200 = vst [vmem:[%s191_s21] sm:$0xff] %v199_v4 }
  0x84 PF: > { %s12_s11 = sadd.s32 1, %s358_s11   ;;  %s403_s9 = smov %s354_s10 }
  0x85   : > { %p9_p5 = scmp.ge.s32.totalorder %s12_s11, 4   ;;  %s404_s10 = smov %s406_s12 }
  0x87   :  { %11 = sbr.rel (!%p9_p5) target bundleno = 2 (0x2), region = 61 }

</bundles_post_ra>
